<compile_context>
chip_gen: v7x
topology: tpu7x:2x2x1
jax: 0.10.0
libtpu: 0.0.40
codegen_flags: <defaults>
</compile_context>

<pallas_src>
import functools
import math

import jax
import jax.numpy as jnp
from jax.experimental import pallas as pl
from jax.experimental.pallas import tpu as pltpu


def _round_up(x, m):
    return ((x + m - 1) // m) * m


def _vmem_capacity_bytes():
    """Per-core VMEM capacity, with a conservative fallback (v7x: 64 MiB/TC)."""
    try:
        info = pltpu.get_tpu_info()
        for attr in ("vmem_capacity_bytes", "vmem_size_bytes", "vmem_bytes"):
            v = getattr(info, attr, None)
            if v:
                return int(v)
    except Exception:  # pragma: no cover - query unavailable
        pass
    return 64 * 1024 * 1024


def _timestep_embedder_kernel(t_ref, f_ref, w1_ref, b1_ref, w2_ref, b2_ref,
                              o_ref, emb_sc, *, half):
    # Sinusoid arguments stay strictly f32 (t can be ~1e3, freqs O(1)).
    args = t_ref[...] * f_ref[...]                              # (bn, half) f32
    # Build [cos | sin] directly in a lane-dense bf16 scratch so the first
    # Linear is one K=2*half matmul (full MXU systolic depth on v6e/v7x).
    emb_sc[:, :half] = jnp.cos(args).astype(jnp.bfloat16)
    emb_sc[:, half:] = jnp.sin(args).astype(jnp.bfloat16)
    h = jnp.dot(emb_sc[...], w1_ref[...],
                preferred_element_type=jnp.float32) + b1_ref[...]
    # SiLU via tanh: x*sigmoid(x) = 0.5*x*(tanh(0.5*x) + 1)  -> single EUP push.
    h = 0.5 * h * (jnp.tanh(0.5 * h) + 1.0)
    out = jnp.dot(h.astype(jnp.bfloat16), w2_ref[...],
                  preferred_element_type=jnp.float32) + b2_ref[...]
    o_ref[...] = out.astype(o_ref.dtype)


def prepare_params(params, frequency_embedding_size=256, max_period=10000):
    """One-time parameter prep (pad to lane-dense shapes, cast weights to bf16).

    Call once and reuse the result for every timestep_embedder() call so that
    the per-step path contains only the Pallas kernel.
    """
    w1, b1, w2, b2 = params["w1"], params["b1"], params["w2"], params["b2"]
    d = frequency_embedding_size
    assert d % 2 == 0, "frequency_embedding_size must be even"
    half = d // 2
    hidden = w2.shape[1]
    hidden_p = _round_up(hidden, 128)

    freqs = jnp.exp(
        -math.log(max_period) * jnp.arange(half, dtype=jnp.float32) / half
    ).reshape(1, half)

    # Zero-padded hidden columns/rows: padded h is exactly 0 -> SiLU(0)=0 ->
    # padded output columns are 0 and are sliced off by the wrapper.
    w1_p = jnp.zeros((d, hidden_p), jnp.float32).at[:, :hidden].set(
        jnp.asarray(w1, jnp.float32)).astype(jnp.bfloat16)
    w2_p = jnp.zeros((hidden_p, hidden_p), jnp.float32).at[:hidden, :hidden].set(
        jnp.asarray(w2, jnp.float32)).astype(jnp.bfloat16)
    b1_p = jnp.zeros((1, hidden_p), jnp.float32).at[0, :hidden].set(
        jnp.asarray(b1, jnp.float32))
    b2_p = jnp.zeros((1, hidden_p), jnp.float32).at[0, :hidden].set(
        jnp.asarray(b2, jnp.float32))

    return {
        "freqs": freqs, "w1": w1_p, "b1": b1_p, "w2": w2_p, "b2": b2_p,
        "d": d, "half": half, "hidden": hidden, "hidden_p": hidden_p,
    }


def timestep_embedder(t, prepared, *, row_block=256, out_dtype=jnp.float32):
    """t: (N,) float array of timesteps. Returns (N, hidden) embeddings."""
    n = t.shape[0]
    d, half = prepared["d"], prepared["half"]
    hidden, hidden_p = prepared["hidden"], prepared["hidden_p"]

    # Row-block selection: multiple of 8 sublanes, sized to avoid padding a
    # near-empty last block (e.g. N=300 with row_block=256 -> bn=152, not 256).
    n8 = _round_up(max(n, 1), 8)
    if n8 <= row_block:
        n_blocks, bn = 1, n8
    else:
        n_blocks = -(-n8 // row_block)
        bn = _round_up(-(-n8 // n_blocks), 8)
    n_pad = bn * n_blocks

    t2 = jnp.zeros((n_pad, 1), jnp.float32).at[:n, 0].set(t.astype(jnp.float32))

    # --- VMEM accounting (residents single-buffered, tiled blocks doubled). ---
    resident_bytes = (half * 4                        # freqs f32
                      + d * hidden_p * 2              # w1 bf16 ([w1_cos; w1_sin])
                      + hidden_p * hidden_p * 2       # w2 bf16
                      + 2 * hidden_p * 4)             # biases f32
    tiled_bytes = 2 * (bn * 4 + bn * hidden_p * 4)    # t + out blocks, dbl-buf
    scratch_bytes = bn * d * 2                        # [cos|sin] bf16 scratch
    footprint = resident_bytes + tiled_bytes + scratch_bytes
    cap = int(0.75 * _vmem_capacity_bytes())
    if footprint > cap:
        # TODO(synk): add a w2 output-column tiling path (second grid axis,
        # h kept in a (bn, hidden_p) scratch) for hidden sizes whose resident
        # weights exceed the per-core VMEM budget (mainly v7x's 64 MiB/TC).
        raise ValueError(
            f"TimestepEmbedder VMEM footprint {footprint} B exceeds budget "
            f"{cap} B; reduce hidden_size or tile w2 columns.")
    # Extra resident_bytes of slack covers the double-buffered fallback below.
    vmem_limit = int(min(cap, footprint + resident_bytes + 4 * 1024 * 1024))

    grid = (n_pad // bn,)
    semantics = ("parallel",) if grid[0] > 2 else ("arbitrary",)
    kernel = functools.partial(_timestep_embedder_kernel, half=half)

    def run(single_buffer_residents):
        if single_buffer_residents:
            def resident(shape):
                return pl.BlockSpec(shape, lambda i: (0,) * len(shape),
                                    pipeline_mode=pl.Buffered(1))
        else:
            def resident(shape):
                return pl.BlockSpec(shape, lambda i: (0,) * len(shape))
        return pl.pallas_call(
            kernel,
            out_shape=jax.ShapeDtypeStruct((n_pad, hidden_p), out_dtype),
            grid=grid,
            in_specs=[
                pl.BlockSpec((bn, 1), lambda i: (i, 0)),   # t rows: tiled
                resident((1, half)),                        # freqs
                resident((d, hidden_p)),                    # w1 (cos/sin rows)
                resident((1, hidden_p)),                    # b1
                resident((hidden_p, hidden_p)),             # w2
                resident((1, hidden_p)),                    # b2
            ],
            out_specs=pl.BlockSpec((bn, hidden_p), lambda i: (i, 0)),
            scratch_shapes=[pltpu.VMEM((bn, d), jnp.bfloat16)],
            compiler_params=pltpu.CompilerParams(
                dimension_semantics=semantics,
                vmem_limit_bytes=vmem_limit,
            ),
        )(t2, prepared["freqs"], prepared["w1"], prepared["b1"],
          prepared["w2"], prepared["b2"])

    try:
        out = run(single_buffer_residents=True)
    except Exception:  # pragma: no cover - Buffered(1) unsupported on this jax
        out = run(single_buffer_residents=False)

    if n_pad == n and hidden_p == hidden:
        return out                      # skip the slice-copy for aligned shapes
    return out[:n, :hidden]


def init_params(key, hidden_size, frequency_embedding_size=256):
    """Deterministic synthetic parameters (shapes match the nn.Module)."""
    k1, k2, k3, k4 = jax.random.split(key, 4)
    d = frequency_embedding_size
    h = hidden_size
    # Stored as (in, out): PyTorch weight (out, in) transposed.
    w1 = jax.random.normal(k1, (d, h), jnp.float32) * (1.0 / math.sqrt(d))
    b1 = jax.random.normal(k2, (h,), jnp.float32) * 0.01
    w2 = jax.random.normal(k3, (h, h), jnp.float32) * (1.0 / math.sqrt(h))
    b2 = jax.random.normal(k4, (h,), jnp.float32) * 0.01
    return {"w1": w1, "b1": b1, "w2": w2, "b2": b2}


def _reference(t, params, frequency_embedding_size=256, max_period=10000):
    """Pure-JAX f32 reference for correctness check."""
    half = frequency_embedding_size // 2
    freqs = jnp.exp(
        -math.log(max_period) * jnp.arange(half, dtype=jnp.float32) / half
    )
    args = t.astype(jnp.float32)[:, None] * freqs[None]
    emb = jnp.concatenate([jnp.cos(args), jnp.sin(args)], axis=-1)
    h = emb @ params["w1"] + params["b1"]
    h = jax.nn.silu(h)
    return h @ params["w2"] + params["b2"]


if __name__ == "__main__":
    key = jax.random.PRNGKey(0)
    k_t, k_p = jax.random.split(key)

    N = 2
    HIDDEN = 32
    FREQ_DIM = 256

    t = jax.random.uniform(k_t, (N,), jnp.float32) * 1000.0  # fractional steps
    params = init_params(k_p, HIDDEN, FREQ_DIM)

    prepared = prepare_params(params, frequency_embedding_size=FREQ_DIM)
    out = timestep_embedder(t, prepared)
    out = jax.block_until_ready(out)

    ref = _reference(t, params, frequency_embedding_size=FREQ_DIM)
    assert out.shape == (N, HIDDEN), out.shape
    # bf16 matmul operands with f32 accumulation -> compare to the f32
    # reference with a bf16-appropriate tolerance.
    assert jnp.allclose(out, ref, atol=5e-2, rtol=5e-2), float(
        jnp.max(jnp.abs(out - ref))
    )

    print("KERNEL_OK")
</pallas_src>

<mosaic_0001>
module attributes {stable_mosaic.version = 11 : i64} {
  func.func @_timestep_embedder_kernel(%arg0: i32, %arg1: memref<8x1xf32, #tpu.memory_space<vmem>>, %arg2: memref<1x128xf32, #tpu.memory_space<vmem>>, %arg3: memref<256x128xbf16, #tpu.memory_space<vmem>>, %arg4: memref<1x128xf32, #tpu.memory_space<vmem>>, %arg5: memref<128x128xbf16, #tpu.memory_space<vmem>>, %arg6: memref<1x128xf32, #tpu.memory_space<vmem>>, %arg7: memref<8x128xf32, #tpu.memory_space<vmem>>, %arg8: memref<8x256xbf16, #tpu.memory_space<vmem>>) attributes {dimension_semantics = [#tpu.dimension_semantics<arbitrary>], iteration_bounds = array<i64: 1>, scalar_prefetch = 0 : i64, scratch_operands = 1 : i64, tpu.core_type = #tpu.core_type<tc>, window_params = [{transform_indices = @transform_0, window_bounds = array<i64: 8, 1>}, {pipeline_mode = #tpu.pipeline_mode<synchronous>, transform_indices = @transform_1, window_bounds = array<i64: 1, 128>}, {pipeline_mode = #tpu.pipeline_mode<synchronous>, transform_indices = @transform_2, window_bounds = array<i64: 256, 128>}, {pipeline_mode = #tpu.pipeline_mode<synchronous>, transform_indices = @transform_3, window_bounds = array<i64: 1, 128>}, {pipeline_mode = #tpu.pipeline_mode<synchronous>, transform_indices = @transform_4, window_bounds = array<i64: 128, 128>}, {pipeline_mode = #tpu.pipeline_mode<synchronous>, transform_indices = @transform_5, window_bounds = array<i64: 1, 128>}, {transform_indices = @transform_6, window_bounds = array<i64: 8, 128>}]} {
    %c0 = arith.constant 0 : index
    %c0_0 = arith.constant 0 : index
    %0 = vector.load %arg1[%c0, %c0_0] : memref<8x1xf32, #tpu.memory_space<vmem>>, vector<8x1xf32>
    %c0_1 = arith.constant 0 : index
    %c0_2 = arith.constant 0 : index
    %1 = vector.load %arg2[%c0_1, %c0_2] : memref<1x128xf32, #tpu.memory_space<vmem>>, vector<1x128xf32>
    %2 = vector.broadcast %0 : vector<8x1xf32> to vector<8x128xf32>
    %3 = vector.broadcast %1 : vector<1x128xf32> to vector<8x128xf32>
    %4 = arith.mulf %2, %3 : vector<8x128xf32>
    %5 = math.cos %4 : vector<8x128xf32>
    %6 = arith.truncf %5 : vector<8x128xf32> to vector<8x128xbf16>
    %c0_3 = arith.constant 0 : index
    %c0_4 = arith.constant 0 : index
    %7 = vector.load %arg8[%c0_3, %c0_4] : memref<8x256xbf16, #tpu.memory_space<vmem>>, vector<8x128xbf16>
    tpu.vector_store %arg8[%c0_3, %c0_4], %6 {strides = array<i32>} : memref<8x256xbf16, #tpu.memory_space<vmem>>, vector<8x128xbf16>,
    %8 = math.sin %4 : vector<8x128xf32>
    %9 = arith.truncf %8 : vector<8x128xf32> to vector<8x128xbf16>
    %c0_5 = arith.constant 0 : index
    %c128 = arith.constant 128 : index
    %10 = vector.load %arg8[%c0_5, %c128] : memref<8x256xbf16, #tpu.memory_space<vmem>>, vector<8x128xbf16>
    tpu.vector_store %arg8[%c0_5, %c128], %9 {strides = array<i32>} : memref<8x256xbf16, #tpu.memory_space<vmem>>, vector<8x128xbf16>,
    %c0_6 = arith.constant 0 : index
    %c0_7 = arith.constant 0 : index
    %11 = vector.load %arg8[%c0_6, %c0_7] : memref<8x256xbf16, #tpu.memory_space<vmem>>, vector<8x256xbf16>
    %c0_8 = arith.constant 0 : index
    %c0_9 = arith.constant 0 : index
    %12 = vector.load %arg3[%c0_8, %c0_9] : memref<256x128xbf16, #tpu.memory_space<vmem>>, vector<256x128xbf16>
    %cst = arith.constant dense<0.000000e+00> : vector<8x128xf32>
    %13 = tpu.matmul %11, %12, %cst {dimension_numbers = #tpu.dot_dimension_numbers<[1], [0], [0], [1], [0, 0, 1, 1], [], []>} : vector<8x256xbf16>, vector<256x128xbf16>, vector<8x128xf32> -> vector<8x128xf32>
    %c0_10 = arith.constant 0 : index
    %c0_11 = arith.constant 0 : index
    %14 = vector.load %arg4[%c0_10, %c0_11] : memref<1x128xf32, #tpu.memory_space<vmem>>, vector<1x128xf32>
    %15 = vector.broadcast %14 : vector<1x128xf32> to vector<8x128xf32>
    %16 = arith.addf %13, %15 : vector<8x128xf32>
    %cst_12 = arith.constant 5.000000e-01 : f32
    %17 = vector.broadcast %cst_12 : f32 to vector<8x128xf32>
    %18 = arith.mulf %17, %16 : vector<8x128xf32>
    %cst_13 = arith.constant 5.000000e-01 : f32
    %19 = vector.broadcast %cst_13 : f32 to vector<8x128xf32>
    %20 = arith.mulf %19, %16 : vector<8x128xf32>
    %21 = math.tanh %20 : vector<8x128xf32>
    %cst_14 = arith.constant 1.000000e+00 : f32
    %22 = vector.broadcast %cst_14 : f32 to vector<8x128xf32>
    %23 = arith.addf %21, %22 : vector<8x128xf32>
    %24 = arith.mulf %18, %23 : vector<8x128xf32>
    %25 = arith.truncf %24 : vector<8x128xf32> to vector<8x128xbf16>
    %c0_15 = arith.constant 0 : index
    %c0_16 = arith.constant 0 : index
    %26 = vector.load %arg5[%c0_15, %c0_16] : memref<128x128xbf16, #tpu.memory_space<vmem>>, vector<128x128xbf16>
    %cst_17 = arith.constant dense<0.000000e+00> : vector<8x128xf32>
    %27 = tpu.matmul %25, %26, %cst_17 {dimension_numbers = #tpu.dot_dimension_numbers<[1], [0], [0], [1], [0, 0, 1, 1], [], []>} : vector<8x128xbf16>, vector<128x128xbf16>, vector<8x128xf32> -> vector<8x128xf32>
    %c0_18 = arith.constant 0 : index
    %c0_19 = arith.constant 0 : index
    %28 = vector.load %arg6[%c0_18, %c0_19] : memref<1x128xf32, #tpu.memory_space<vmem>>, vector<1x128xf32>
    %29 = vector.broadcast %28 : vector<1x128xf32> to vector<8x128xf32>
    %30 = arith.addf %27, %29 : vector<8x128xf32>
    %c0_20 = arith.constant 0 : index
    %c0_21 = arith.constant 0 : index
    %31 = vector.load %arg7[%c0_20, %c0_21] : memref<8x128xf32, #tpu.memory_space<vmem>>, vector<8x128xf32>
    tpu.vector_store %arg7[%c0_20, %c0_21], %30 {strides = array<i32>} : memref<8x128xf32, #tpu.memory_space<vmem>>, vector<8x128xf32>,
    return
  }
  func.func @transform_0(%arg0: i32) -> (i32, i32) {
    %c0_i32 = arith.constant 0 : i32
    %c0_i32_0 = arith.constant 0 : i32
    return %arg0, %c0_i32 : i32, i32
  }
  func.func @transform_1(%arg0: i32) -> (i32, i32) {
    %c0_i32 = arith.constant 0 : i32
    %c0_i32_0 = arith.constant 0 : i32
    %c0_i32_1 = arith.constant 0 : i32
    return %c0_i32, %c0_i32_0 : i32, i32
  }
  func.func @transform_2(%arg0: i32) -> (i32, i32) {
    %c0_i32 = arith.constant 0 : i32
    %c0_i32_0 = arith.constant 0 : i32
    %c0_i32_1 = arith.constant 0 : i32
    return %c0_i32, %c0_i32_0 : i32, i32
  }
  func.func @transform_3(%arg0: i32) -> (i32, i32) {
    %c0_i32 = arith.constant 0 : i32
    %c0_i32_0 = arith.constant 0 : i32
    %c0_i32_1 = arith.constant 0 : i32
    return %c0_i32, %c0_i32_0 : i32, i32
  }
  func.func @transform_4(%arg0: i32) -> (i32, i32) {
    %c0_i32 = arith.constant 0 : i32
    %c0_i32_0 = arith.constant 0 : i32
    %c0_i32_1 = arith.constant 0 : i32
    return %c0_i32, %c0_i32_0 : i32, i32
  }
  func.func @transform_5(%arg0: i32) -> (i32, i32) {
    %c0_i32 = arith.constant 0 : i32
    %c0_i32_0 = arith.constant 0 : i32
    %c0_i32_1 = arith.constant 0 : i32
    return %c0_i32, %c0_i32_0 : i32, i32
  }
  func.func @transform_6(%arg0: i32) -> (i32, i32) {
    %c0_i32 = arith.constant 0 : i32
    %c0_i32_0 = arith.constant 0 : i32
    return %arg0, %c0_i32 : i32, i32
  }
}

module attributes {stable_mosaic.version = 11 : i64} {
  func.func @_timestep_embedder_kernel(%arg0: i32, %arg1: memref<8x1xf32, #tpu.memory_space<vmem>>, %arg2: memref<1x128xf32, #tpu.memory_space<vmem>>, %arg3: memref<256x128xbf16, #tpu.memory_space<vmem>>, %arg4: memref<1x128xf32, #tpu.memory_space<vmem>>, %arg5: memref<128x128xbf16, #tpu.memory_space<vmem>>, %arg6: memref<1x128xf32, #tpu.memory_space<vmem>>, %arg7: memref<8x128xf32, #tpu.memory_space<vmem>>, %arg8: memref<8x256xbf16, #tpu.memory_space<vmem>>) attributes {dimension_semantics = [#tpu.dimension_semantics<arbitrary>], iteration_bounds = array<i64: 1>, scalar_prefetch = 0 : i64, scratch_operands = 1 : i64, tpu.core_type = #tpu.core_type<tc>, window_params = [{transform_indices = @transform_0, window_bounds = array<i64: 8, 1>}, {pipeline_mode = #tpu.pipeline_mode<synchronous>, transform_indices = @transform_1, window_bounds = array<i64: 1, 128>}, {pipeline_mode = #tpu.pipeline_mode<synchronous>, transform_indices = @transform_2, window_bounds = array<i64: 256, 128>}, {pipeline_mode = #tpu.pipeline_mode<synchronous>, transform_indices = @transform_3, window_bounds = array<i64: 1, 128>}, {pipeline_mode = #tpu.pipeline_mode<synchronous>, transform_indices = @transform_4, window_bounds = array<i64: 128, 128>}, {pipeline_mode = #tpu.pipeline_mode<synchronous>, transform_indices = @transform_5, window_bounds = array<i64: 1, 128>}, {transform_indices = @transform_6, window_bounds = array<i64: 8, 128>}]} {
    %c0 = arith.constant 0 : index
    %c0_0 = arith.constant 0 : index
    %0 = vector.load %arg1[%c0, %c0_0] : memref<8x1xf32, #tpu.memory_space<vmem>>, vector<8x1xf32>
    %c0_1 = arith.constant 0 : index
    %c0_2 = arith.constant 0 : index
    %1 = vector.load %arg2[%c0_1, %c0_2] : memref<1x128xf32, #tpu.memory_space<vmem>>, vector<1x128xf32>
    %2 = vector.broadcast %0 : vector<8x1xf32> to vector<8x128xf32>
    %3 = vector.broadcast %1 : vector<1x128xf32> to vector<8x128xf32>
    %4 = arith.mulf %2, %3 : vector<8x128xf32>
    %5 = math.cos %4 : vector<8x128xf32>
    %6 = arith.truncf %5 : vector<8x128xf32> to vector<8x128xbf16>
    %c0_3 = arith.constant 0 : index
    %c0_4 = arith.constant 0 : index
    %7 = vector.load %arg8[%c0_3, %c0_4] : memref<8x256xbf16, #tpu.memory_space<vmem>>, vector<8x128xbf16>
    tpu.vector_store %arg8[%c0_3, %c0_4], %6 {strides = array<i32>} : memref<8x256xbf16, #tpu.memory_space<vmem>>, vector<8x128xbf16>,
    %8 = math.sin %4 : vector<8x128xf32>
    %9 = arith.truncf %8 : vector<8x128xf32> to vector<8x128xbf16>
    %c0_5 = arith.constant 0 : index
    %c128 = arith.constant 128 : index
    %10 = vector.load %arg8[%c0_5, %c128] : memref<8x256xbf16, #tpu.memory_space<vmem>>, vector<8x128xbf16>
    tpu.vector_store %arg8[%c0_5, %c128], %9 {strides = array<i32>} : memref<8x256xbf16, #tpu.memory_space<vmem>>, vector<8x128xbf16>,
    %c0_6 = arith.constant 0 : index
    %c0_7 = arith.constant 0 : index
    %11 = vector.load %arg8[%c0_6, %c0_7] : memref<8x256xbf16, #tpu.memory_space<vmem>>, vector<8x256xbf16>
    %c0_8 = arith.constant 0 : index
    %c0_9 = arith.constant 0 : index
    %12 = vector.load %arg3[%c0_8, %c0_9] : memref<256x128xbf16, #tpu.memory_space<vmem>>, vector<256x128xbf16>
    %cst = arith.constant dense<0.000000e+00> : vector<8x128xf32>
    %13 = tpu.matmul %11, %12, %cst {dimension_numbers = #tpu.dot_dimension_numbers<[1], [0], [0], [1], [0, 0, 1, 1], [], []>} : vector<8x256xbf16>, vector<256x128xbf16>, vector<8x128xf32> -> vector<8x128xf32>
    %c0_10 = arith.constant 0 : index
    %c0_11 = arith.constant 0 : index
    %14 = vector.load %arg4[%c0_10, %c0_11] : memref<1x128xf32, #tpu.memory_space<vmem>>, vector<1x128xf32>
    %15 = vector.broadcast %14 : vector<1x128xf32> to vector<8x128xf32>
    %16 = arith.addf %13, %15 : vector<8x128xf32>
    %cst_12 = arith.constant 5.000000e-01 : f32
    %17 = vector.broadcast %cst_12 : f32 to vector<8x128xf32>
    %18 = arith.mulf %17, %16 : vector<8x128xf32>
    %cst_13 = arith.constant 5.000000e-01 : f32
    %19 = vector.broadcast %cst_13 : f32 to vector<8x128xf32>
    %20 = arith.mulf %19, %16 : vector<8x128xf32>
    %21 = math.tanh %20 : vector<8x128xf32>
    %cst_14 = arith.constant 1.000000e+00 : f32
    %22 = vector.broadcast %cst_14 : f32 to vector<8x128xf32>
    %23 = arith.addf %21, %22 : vector<8x128xf32>
    %24 = arith.mulf %18, %23 : vector<8x128xf32>
    %25 = arith.truncf %24 : vector<8x128xf32> to vector<8x128xbf16>
    %c0_15 = arith.constant 0 : index
    %c0_16 = arith.constant 0 : index
    %26 = vector.load %arg5[%c0_15, %c0_16] : memref<128x128xbf16, #tpu.memory_space<vmem>>, vector<128x128xbf16>
    %cst_17 = arith.constant dense<0.000000e+00> : vector<8x128xf32>
    %27 = tpu.matmul %25, %26, %cst_17 {dimension_numbers = #tpu.dot_dimension_numbers<[1], [0], [0], [1], [0, 0, 1, 1], [], []>} : vector<8x128xbf16>, vector<128x128xbf16>, vector<8x128xf32> -> vector<8x128xf32>
    %c0_18 = arith.constant 0 : index
    %c0_19 = arith.constant 0 : index
    %28 = vector.load %arg6[%c0_18, %c0_19] : memref<1x128xf32, #tpu.memory_space<vmem>>, vector<1x128xf32>
    %29 = vector.broadcast %28 : vector<1x128xf32> to vector<8x128xf32>
    %30 = arith.addf %27, %29 : vector<8x128xf32>
    %c0_20 = arith.constant 0 : index
    %c0_21 = arith.constant 0 : index
    %31 = vector.load %arg7[%c0_20, %c0_21] : memref<8x128xf32, #tpu.memory_space<vmem>>, vector<8x128xf32>
    tpu.vector_store %arg7[%c0_20, %c0_21], %30 {strides = array<i32>} : memref<8x128xf32, #tpu.memory_space<vmem>>, vector<8x128xf32>,
    return
  }
  func.func @transform_0(%arg0: i32) -> (i32, i32) {
    %c0_i32 = arith.constant 0 : i32
    %c0_i32_0 = arith.constant 0 : i32
    return %arg0, %c0_i32 : i32, i32
  }
  func.func @transform_1(%arg0: i32) -> (i32, i32) {
    %c0_i32 = arith.constant 0 : i32
    %c0_i32_0 = arith.constant 0 : i32
    %c0_i32_1 = arith.constant 0 : i32
    return %c0_i32, %c0_i32_0 : i32, i32
  }
  func.func @transform_2(%arg0: i32) -> (i32, i32) {
    %c0_i32 = arith.constant 0 : i32
    %c0_i32_0 = arith.constant 0 : i32
    %c0_i32_1 = arith.constant 0 : i32
    return %c0_i32, %c0_i32_0 : i32, i32
  }
  func.func @transform_3(%arg0: i32) -> (i32, i32) {
    %c0_i32 = arith.constant 0 : i32
    %c0_i32_0 = arith.constant 0 : i32
    %c0_i32_1 = arith.constant 0 : i32
    return %c0_i32, %c0_i32_0 : i32, i32
  }
  func.func @transform_4(%arg0: i32) -> (i32, i32) {
    %c0_i32 = arith.constant 0 : i32
    %c0_i32_0 = arith.constant 0 : i32
    %c0_i32_1 = arith.constant 0 : i32
    return %c0_i32, %c0_i32_0 : i32, i32
  }
  func.func @transform_5(%arg0: i32) -> (i32, i32) {
    %c0_i32 = arith.constant 0 : i32
    %c0_i32_0 = arith.constant 0 : i32
    %c0_i32_1 = arith.constant 0 : i32
    return %c0_i32, %c0_i32_0 : i32, i32
  }
  func.func @transform_6(%arg0: i32) -> (i32, i32) {
    %c0_i32 = arith.constant 0 : i32
    %c0_i32_0 = arith.constant 0 : i32
    return %arg0, %c0_i32 : i32, i32
  }
}

</mosaic_0001>

<bundles_post_ra>
// kernel: tpu_custom_call.1
= control target key start
LH: loop header
LB: loop body
LE: loop exit
PB: predicated region body
PF: predicated region fallthrough
CT: control target
= control target key end

     0   :  { %11 = vsyncpa [#allocation4], 0  ;;  %s932_s0 = inlined_call_operand.vmem [shape: f32[8,1], index: 0, kind: input, shape index: {}]   ;;  %s933_s1 = inlined_call_operand.vmem [shape: f32[1,128], index: 1, kind: input, shape index: {}]   ;;  %s934_s2 = inlined_call_operand.hbm [shape: bf16[256,128], index: 2, kind: input, shape index: {}]   ;;  %s935_s3 = inlined_call_operand.vmem [shape: f32[1,128], index: 3, kind: input, shape index: {}]   ;;  %s936_s4 = inlined_call_operand.hbm [shape: bf16[128,128], index: 4, kind: input, shape index: {}]   ;;  %s937_s5 = inlined_call_operand.vmem [shape: f32[1,128], index: 5, kind: input, shape index: {}]   ;;  %s938_s6 = inlined_call_operand.hbm [shape: f32[8,128], index: 6, kind: output, shape index: {}]  }
   0x1   :  { %12 = vsyncpa [#allocation7], 0 }
   0x2   :  { %13 = vsyncpa [#allocation5], 0  ;;  %s805_s21 = smov [#allocation3]   ;;  %s733_s25 = scalar_lea.hbm %s934_s2, 2048 }
   0x3   :  { %s23_s22 = sshll.u32 %s805_s21, 4  ;;  %p734_p0 = scmp.ne.s32.totalorder %s934_s2, %s733_s25  ;;  %s24_s22 = int_to_ptr.vmem [resolvable:$true] %s23_s22 }
   0x4   :  { %p737_p1 = scmp.lt.u32.totalorder %s733_s25, %s934_s2 }
   0x6   :  { %p739_p2 = pnand %p737_p1, %p734_p0 }
   0x8   :  { %742 = shalt.err (!%p739_p2)
}
   0x9   :  { %s743_s30 = scalar_lea.vmem %s24_s22, 2048  ;;  %p748_p4 = scmp.lt.s32.totalorder %s24_s22, %s24_s22 }
   0xa   :  { %p744_p3 = scmp.ne.s32.totalorder %s24_s22, %s743_s30  ;;  %p749_p5 = scmp.lt.s32.totalorder %s743_s30, %s743_s30 }
   0xc   :  { %p750_p6 = por %p749_p5, %p748_p4 }
   0xe   :  { %p751_p7 = pnand %p750_p6, %p744_p3 }
  0x10   :  { %754 = shalt.err (!%p751_p7)
}
  0x11   :  { %s806_s7 = smov 64   ;;  %s807_s8 = smov 4  }
  0x12   :  { %29 = dma.hbm_to_vmem [thread:$0]  %s934_s2, 2048, %s24_s22, [#allocation4], %s806_s7, %s806_s7, %s807_s8  }
  0x13   :  { %s808_s11 = smov [#allocation6]   ;;  %s755_s15 = scalar_lea.hbm %s936_s4, 1024 }
  0x14   :  { %s37_s12 = sshll.u32 %s808_s11, 4  ;;  %p756_p8 = scmp.ne.s32.totalorder %s936_s4, %s755_s15  ;;  %s38_s12 = int_to_ptr.vmem [resolvable:$true] %s37_s12 }
  0x15   :  { %p759_p9 = scmp.lt.u32.totalorder %s755_s15, %s936_s4 }
  0x17   :  { %p761_p10 = pnand %p759_p9, %p756_p8 }
  0x19   :  { %764 = shalt.err (!%p761_p10)
}
  0x1a   :  { %s765_s20 = scalar_lea.vmem %s38_s12, 1024  ;;  %p770_p12 = scmp.lt.s32.totalorder %s38_s12, %s38_s12 }
  0x1b   :  { %p766_p11 = scmp.ne.s32.totalorder %s38_s12, %s765_s20  ;;  %p771_p13 = scmp.lt.s32.totalorder %s765_s20, %s765_s20 }
  0x1d   :  { %p772_p0 = por %p771_p13, %p770_p12 }
  0x1f   :  { %p773_p1 = pnand %p772_p0, %p766_p11 }
  0x21   :  { %776 = shalt.err (!%p773_p1)
}
  0x22   :  { %43 = dma.hbm_to_vmem [thread:$0]  %s936_s4, 1024, %s38_s12, [#allocation7], %s806_s7, %s806_s7, %s807_s8  }
  0x23   :  { %799 = dma.done.wait [#allocation4], 2048  }
  0x24   :  { %800 = vsyncadd [#allocation4], 4294965248 }
  0x25   :  { %801 = dma.done.wait [#allocation7], 1024  }
  0x26   :  { %802 = vsyncadd [#allocation7], 4294966272  ;;  %v809_v0 = vmov 0   ;;  %v53_v1 = vld [vmem:[%s932_s0] sm:$0xff]  ;;  %v701_v2 = vld [vmem:[#allocation3 + $0x40] sm:$0xff]   ;;  %v810_v19 = vmov 0.0  }
  0x27   :  { %700 = vset.pattern.permute.xlu0 %v809_v0  ;;  %v702_v3 = vld [vmem:[#allocation3] sm:$0xff]   ;;  %631 = vmatprep.subr.bf16.mxu0 %v701_v2  ;;  %v703_v4 = vld [vmem:[#allocation3 + $0x48] sm:$0xff]   ;;  %v705_v6 = vld [vmem:[#allocation3 + $0x50] sm:$0xff]   ;;  %v811_v34 = vmov 683565275   ;;  %s818_s27 = smov [#allocation8]  }
  0x28   :  { %57 = vperm.xlu0 %700, %v53_v1   ;;  %632 = vmatpush3.bf16.msra.mxu0 %v702_v3  ;;  %v704_v5 = vld [vmem:[#allocation3 + $0x8] sm:$0xff]   ;;  %v706_v7 = vld [vmem:[#allocation3 + $0x10] sm:$0xff]   ;;  %v707_v8 = vld [vmem:[#allocation3 + $0x58] sm:$0xff]   ;;  %v812_v36 = vmov 2475754826   ;;  %s584_s28 = sshll.u32 %s818_s27, 4  ;;  %s585_s28 = int_to_ptr.vmem [resolvable:$true] %s584_s28 }
  0x29   :  { %633 = vmatprep.subr.bf16.mxu0 %v703_v4  ;;  %v708_v9 = vld [vmem:[#allocation3 + $0x18] sm:$0xff]   ;;  %v709_v10 = vld [vmem:[#allocation3 + $0x60] sm:$0xff]   ;;  %v711_v12 = vld [vmem:[#allocation3 + $0x68] sm:$0xff]   ;;  %662 = vmatprep.subr.bf16.mxu1 %v810_v19  ;;  %v813_v39 = vmov 2131351028   ;;  %p782_p3 = scmp.lt.s32.totalorder %s585_s28, %s585_s28 }
  0x2a   :  { %v710_v11 = vld [vmem:[#allocation3 + $0x20] sm:$0xff]   ;;  %v712_v13 = vld [vmem:[#allocation3 + $0x28] sm:$0xff]   ;;  %v713_v14 = vld [vmem:[#allocation3 + $0x70] sm:$0xff]   ;;  %v814_v42 = vmov 2102212464  }
  0x2b   :  { %v714_v15 = vld [vmem:[#allocation3 + $0x30] sm:$0xff]   ;;  %v715_v16 = vld [vmem:[#allocation3 + $0x78] sm:$0xff]   ;;  %v719_v18 = vld [vmem:[#allocation6] sm:$0xff]   ;;  %v815_v45 = vmov 920167782  }
  0x2c   :  { %634 = vmatpush3.bf16.msra.mxu0 %v704_v5  ;;  %v716_v17 = vld [vmem:[#allocation3 + $0x38] sm:$0xff]   ;;  %663 = vmatpush3.bf16.msra.mxu1 %v719_v18  ;;  %v720_v20 = vld [vmem:[#allocation6 + $0x8] sm:$0xff]   ;;  %v816_v48 = vmov 1326507024  }
  0x2d   :  { %635 = vmatprep.subr.bf16.mxu0 %v705_v6  ;;  %664 = vmatprep.subr.bf16.mxu1 %v810_v19  ;;  %v594_v21 = vld [vmem:[%s933_s1] ss:$0 sm:$0xff] }
  0x30   :  { %636 = vmatpush3.bf16.msra.mxu0 %v706_v7  ;;  %665 = vmatpush3.bf16.msra.mxu1 %v720_v20 }
  0x31   :  { %637 = vmatprep.subr.bf16.mxu0 %v707_v8  ;;  %666 = vmatprep.subr.bf16.mxu1 %v810_v19 }
  0x34   :  { %638 = vmatpush3.bf16.msra.mxu0 %v708_v9 }
  0x35   :  { %639 = vmatprep.subr.bf16.mxu0 %v709_v10 }
  0x38   :  { %640 = vmatpush3.bf16.msra.mxu0 %v710_v11 }
  0x39   :  { %641 = vmatprep.subr.bf16.mxu0 %v711_v12 }
  0x3c   :  { %642 = vmatpush3.bf16.msra.mxu0 %v712_v13 }
  0x3d   :  { %643 = vmatprep.subr.bf16.mxu0 %v713_v14 }
  0x40   :  { %644 = vmatpush3.bf16.msra.mxu0 %v714_v15 }
  0x41   :  { %645 = vmatprep.subr.bf16.mxu0 %v715_v16 }
  0x44   :  { %646 = vmatpush3.bf16.msra.mxu0 %v716_v17 }
  0xa7   :  { %v58_v22 = vpop.permute.xlu0 %57 }
  0xa8   :  { %v887_v23 = vmul.f32 %v594_v21, %v58_v22 }
  0xaa   :  { %v70_v24 = vand.u32 2139095040, %v887_v23  ;;  %v67_v28 = vand.u32 2147483647, %v887_v23  ;;  %vm69_vm7 = vcmp.lt.s32.totalorder %v887_v23, 0  ;;  %vm159_vm15 = vweird.f32 %v887_v23 }
  0xac   :  { %v71_v25 = vshrl.u32 %v70_v24, 23  ;;  %v74_v31 = vand.u32 8388607, %v67_v28  ;;  %vm68_vm8 = vcmp.le.f32.partialorder %v67_v28, 0.7853982 }
  0xae   :  { %v595_v26 = vadd.s32 4294967169, %v71_v25  ;;  %v75_v50 = vor.u32 8388608, %v74_v31 }
  0xb0   :  { %v77_v27 = vadd.s32 1, %v595_v26  ;;  %v115_v0 = vshll.u32 %v75_v50, 8 }
  0xb2   :  { %vm78_vm0 = vcmp.gt.s32.totalorder %v77_v27, 0 }
  0xb3   :  { %v79_v29 = vsel %vm78_vm0, %v77_v27, 0  ;;  %vm817_vm0 = vmmov 0  }
  0xb4   :  { %v81_v30 = vand.u32 31, %v79_v29  ;;  %v80_v33 = vshrl.u32 %v79_v29, 5  ;;  %678 = vmatprep.mubr.msk.bf16.mxu1 %vm817_vm0, %v810_v19 }
  0xb6   :  { %v82_v32 = vsub.s32 32, %v81_v30  ;;  %v84_v35 = vshll.u32 %v811_v34, %v81_v30  ;;  %v87_v37 = vshll.u32 %v812_v36, %v81_v30  ;;  %v90_v41 = vshll.u32 %v813_v39, %v81_v30 }
  0xb7   :  { %v93_v44 = vshll.u32 %v814_v42, %v81_v30  ;;  %v96_v47 = vshll.u32 %v815_v45, %v81_v30  ;;  %vm99_vm1 = vcmp.lt.s32.totalorder %v80_v33, 1  ;;  %vm102_vm2 = vcmp.lt.s32.totalorder %v80_v33, 4 }
  0xb8   :  { %v85_v38 = vshrl.u32 %v812_v36, %v82_v32  ;;  %v88_v40 = vshrl.u32 %v813_v39, %v82_v32  ;;  %v91_v43 = vshrl.u32 %v814_v42, %v82_v32  ;;  %v94_v46 = vshrl.u32 %v815_v45, %v82_v32 }
  0xb9   :  { %v97_v49 = vshrl.u32 %v816_v48, %v82_v32  ;;  %v83_v59 = vshrl.u32 %v811_v34, %v82_v32  ;;  %vm101_vm3 = vcmp.lt.s32.totalorder %v80_v33, 3  ;;  %vm100_vm4 = vcmp.lt.s32.totalorder %v80_v33, 2 }
  0xba   :  { %v86_v51 = vor.u32 %v85_v38, %v84_v35  ;;  %v89_v52 = vor.u32 %v88_v40, %v87_v37  ;;  %v92_v53 = vor.u32 %v91_v43, %v90_v41  ;;  %v95_v54 = vor.u32 %v94_v46, %v93_v44 }
  0xbb   :  { %v98_v55 = vor.u32 %v97_v49, %v96_v47 }
  0xbc   :  { %v104_v56 = vsel %vm102_vm2, %v92_v53, 2102212464  ;;  %v107_v57 = vsel %vm99_vm1, %v86_v51, %v89_v52  ;;  %v111_v58 = vsel %vm99_vm1, %v89_v52, %v92_v53  ;;  %v108_v60 = vsel %vm102_vm2, %v95_v54, 920167782 }
  0xbd   :  { %v112_v61 = vsel %vm102_vm2, %v98_v55, 1326507024  ;;  %v109_v62 = vsel %vm101_vm3, %v92_v53, %v108_v60  ;;  %v103_v1 = vsel %vm99_vm1, %v83_v59, %v86_v51  ;;  %v105_v2 = vsel %vm101_vm3, %v89_v52, %v104_v56 }
  0xbe   :  { %v113_v63 = vsel %vm101_vm3, %v95_v54, %v112_v61  ;;  %v110_v3 = vsel %vm100_vm4, %v107_v57, %v109_v62  ;;  %v106_v9 = vsel %vm100_vm4, %v103_v1, %v105_v2  ;;  %v724_v1 = vld [vmem:[#allocation6 + $0x28] sm:$0xff]   ;;  %v725_v2 = vld [vmem:[#allocation6 + $0x30] sm:$0xff]  }
  0xbf   :  { %v114_v4 = vsel %vm100_vm4, %v111_v58, %v113_v63  ;;  %v896_v7 = vmul.u32.u64.low %v115_v0, %v110_v3  ;;  %v897_v8 = vmul.u32.u64.high %v115_v0, %v110_v3, %v896_v7  ;;  %v122_v11 = vmul.u32 %v115_v0, %v106_v9  ;;  %v721_v63 = vld [vmem:[#allocation6 + $0x10] sm:$0xff]   ;;  %v726_v3 = vld [vmem:[#allocation6 + $0x38] sm:$0xff]  }
  0xc0   :  { %v893_v5 = vmul.u32.u64.low %v115_v0, %v114_v4  ;;  %v894_v6 = vmul.u32.u64.high %v115_v0, %v114_v4, %v893_v5  ;;  %667 = vmatpush3.bf16.msra.mxu1 %v721_v63  ;;  %v722_v0 = vld [vmem:[#allocation6 + $0x18] sm:$0xff]  }
  0xc1   :  { %v125_v10 = vadd.s32 1, %v897_v8  ;;  %668 = vmatprep.subr.bf16.mxu1 %v810_v19  ;;  %v603_v5 = vld [vmem:[%s935_s3] ss:$0 sm:$0xff]  ;;  %s777_s3 = scalar_lea.vmem %s585_s28, 128 }
  0xc2   :  { %vm124_vm5 = vc.u32 %v894_v6, %v896_v7  ;;  %v123_v25 = vadd.s32 %v896_v7, %v894_v6  ;;  %p778_p2 = scmp.ne.s32.totalorder %s585_s28, %s777_s3  ;;  %p783_p4 = scmp.lt.s32.totalorder %s777_s3, %s777_s3 }
  0xc3   :  { %v126_v12 = vsel %vm124_vm5, %v125_v10, %v897_v8 }
  0xc4   :  { %v127_v13 = vadd.s32 %v126_v12, %v122_v11  ;;  %669 = vmatpush3.bf16.msra.mxu1 %v722_v0  ;;  %p784_p5 = por %p783_p4, %p782_p3 }
  0xc5   :  { %670 = vmatprep.subr.bf16.mxu1 %v810_v19 }
  0xc6   :  { %v128_v14 = vadd.s32 536870912, %v127_v13  ;;  %p785_p6 = pnand %p784_p5, %p778_p2 }
  0xc8   :  { %v129_v15 = vshrl.u32 %v128_v14, 30 }
  0xca   :  { %v130_v16 = vshll.u32 %v129_v15, 30  ;;  %v153_v38 = vsub.s32 4, %v129_v15 }
  0xcc   :  { %v131_v17 = vsub.s32 %v127_v13, %v130_v16  ;;  %v154_v41 = vsel %vm69_vm7, %v153_v38, %v129_v15 }
  0xcd   :  { %v156_v43 = vsel %vm68_vm8, 0, %v154_v41 }
  0xce   :  { %v133_v18 = vsub.s32 0, %v131_v17  ;;  %v265_v44 = vadd.s32 3, %v156_v43  ;;  %v160_v45 = vand.u32 3, %v156_v43 }
  0xd0   :  { %v596_v20 = vmin.u32 %v133_v18, %v131_v17  ;;  %v266_v46 = vand.u32 3, %v265_v44  ;;  %vm165_vm9 = vcmp.eq.s32.totalorder %v160_v45, 2  ;;  %vm162_vm11 = vcmp.eq.s32.totalorder %v160_v45, 0 }
  0xd1   :  { %vm161_vm13 = vcmp.lt.s32.totalorder %v160_v45, 2 }
  0xd2   :  { %v135_v21 = vclz %v596_v20  ;;  %vm271_vm10 = vcmp.eq.s32.totalorder %v266_v46, 2  ;;  %vm268_vm12 = vcmp.eq.s32.totalorder %v266_v46, 0  ;;  %vm267_vm14 = vcmp.lt.s32.totalorder %v266_v46, 2 }
  0xd4   :  { %v597_v22 = vadd.s32 4294967294, %v135_v21 }
  0xd6   :  { %vm598_vm6 = vcmp.lt.s32.totalorder %v597_v22, 0 }
  0xd7   :  { %v138_v24 = vsel %vm598_vm6, 0, %v597_v22 }
  0xd8   :  { %v139_v26 = vsub.s32 32, %v138_v24  ;;  %v143_v27 = vsub.s32 4294967266, %v138_v24  ;;  %v140_v29 = vshll.u32 %v131_v17, %v138_v24 }
  0xda   :  { %v141_v30 = vshrl.u32 %v123_v25, %v139_v26  ;;  %v144_v31 = vadd.s32 127, %v143_v27 }
  0xdc   :  { %v142_v32 = vor.u32 %v141_v30, %v140_v29  ;;  %v145_v33 = vshll.u32 %v144_v31, 23 }
  0xde   :  { %v146_v34 = vor.u32 4788187, %v145_v33  ;;  %v149_v36 = vcvt.s32.f32 %v142_v32 }
  0xe0   :  { %v147_v35 = vand.u32 2147483647, %v146_v34 }
  0xe2   :  { %v150_v37 = vmul.f32 %v149_v36, %v147_v35 }
  0xe4   :  { %v151_v39 = vxor.u32 2147483648, %v150_v37 }
  0xe6   :  { %v152_v40 = vsel %vm69_vm7, %v151_v39, %v150_v37 }
  0xe7   :  { %v155_v42 = vsel %vm68_vm8, %v887_v23, %v152_v40  ;;  %v723_v23 = vld [vmem:[#allocation6 + $0x20] sm:$0xff]  }
  0xe8   :  { %727 = vcosq.f32 %v155_v42  ;;  %671 = vmatpush3.bf16.msra.mxu1 %v723_v23 }
  0xe9   :  { %729 = vsinq.f32 %v155_v42  ;;  %672 = vmatprep.subr.bf16.mxu1 %v810_v19 }
  0xec   :  { %673 = vmatpush3.bf16.msra.mxu1 %v724_v1 }
  0xed   :  { %674 = vmatprep.subr.bf16.mxu1 %v810_v19 }
  0xf0   :  { %675 = vmatpush3.bf16.msra.mxu1 %v725_v2 }
  0xf1   :  { %676 = vmatprep.subr.bf16.mxu1 %v810_v19  ;;  %v622_v19 = vld [vmem:[%s937_s5] ss:$0 sm:$0xff] }
  0xf2   :  { %v728_v47 = vpop.eup %727 }
  0xf3   :  { %v730_v48 = vpop.eup %729  ;;  %v166_v49 = vxor.u32 2147483648, %v728_v47 }
  0xf4   :  { %v163_v50 = vxor.u32 2147483648, %v730_v48  ;;  %677 = vmatpush3.bf16.msra.mxu1 %v726_v3 }
  0xf5   :  { %v167_v51 = vsel %vm165_vm9, %v166_v49, %v730_v48  ;;  %v273_v28 = vsel %vm271_vm10, %v166_v49, %v730_v48 }
  0xf6   :  { %v164_v52 = vsel %vm162_vm11, %v728_v47, %v163_v50  ;;  %v270_v53 = vsel %vm268_vm12, %v728_v47, %v163_v50 }
  0xf7   :  { %v168_v54 = vsel %vm161_vm13, %v164_v52, %v167_v51  ;;  %v274_v55 = vsel %vm267_vm14, %v270_v53, %v273_v28 }
  0xf8   :  { %v169_v56 = vsel %vm159_vm15, nan, %v168_v54  ;;  %v275_v57 = vsel %vm159_vm15, nan, %v274_v55 }
  0xf9   :  { %v170_v58 = vpack.c.bf16 %v169_v56, %v169_v56  ;;  %v276_v59 = vpack.c.bf16 %v275_v57, %v275_v57 }
  0xfb   :  { %171 = vst [vmem:[#allocation2] sm:$0xf] %v170_v58  ;;  %277 = vst [vmem:[#allocation2 + $0x4] sm:$0xf] %v276_v59 }
 0x102   :  { %v278_v60 = vld [vmem:[#allocation2] sm:$0xff] }
 0x103   :  { %v604_v61 = vcombine.low %v278_v60, %v278_v60  ;;  %v605_v62 = vcombine.high %v278_v60, %v278_v60 }
 0x105   :  { %453 = vmatprep.mubr.bf16.mxu0 %v605_v62 }
 0x106   :  { %454 = vmatmul.mubr.bf16.vlgmr.msra.gmra.mrb[0].mxu0 %v604_v61 }
 0x1d9   :  { %v647_v4 = vpop.f32.mrb[0].mxu0 }
 0x1da   :  { %v648_v6 = vpop.f32.mrb[1].mxu0 }
 0x1db   :  { %v649_v7 = vadd.f32 %v648_v6, %v647_v4  ;;  %v650_v8 = vpop.f32.mrb[2].mxu0 }
 0x1dc   :  { %v651_v9 = vpop.f32.mrb[3].mxu0 }
 0x1dd   :  { %v456_v10 = vadd.f32 %v649_v7, %v603_v5 }
 0x1df   :  { %v461_v11 = vmul.f32 0.5, %v456_v10 }
 0x1e1   :  { %731 = vtanh.f32 %v461_v11 }
 0x1eb   :  { %v732_v12 = vpop.eup %731 }
 0x1ec   :  { %v463_v13 = vadd.f32 1.0, %v732_v12 }
 0x1ee   :  { %v464_v14 = vmul.f32 %v463_v13, %v461_v11 }
 0x1f0   :  { %v465_v15 = vpack.c.bf16 %v464_v14, %v464_v14 }
 0x1f2   :  { %679 = vmatmul.mubr.bf16.vlgmr.msra.gmra.mrb[0].mxu1 %v465_v15 }
 0x2c5   :  { %v571_v16 = vpop.f32.mrb[0].mxu1 }
 0x2c6   :  { %v572_v17 = vadd.f32 %v622_v19, %v571_v16  ;;  %v680_v18 = vpop.f32.mrb[1].mxu1 }
 0x2c7   :  { %v574_v20 = vpop.f32.mrb[2].mxu1 }
 0x2c8   :  { %577 = vst [vmem:[#allocation8] sm:$0xff] %v572_v17  ;;  %v681_v21 = vpop.f32.mrb[3].mxu1 }
 0x2c9   :  { %788 = shalt.err (!%p785_p6)
}
 0x2ca   :  { %s789_s5 = scalar_lea.hbm %s938_s6, 128 }
 0x2cb   :  { %p790_p7 = scmp.ne.s32.totalorder %s938_s6, %s789_s5  ;;  %p793_p8 = scmp.lt.u32.totalorder %s789_s5, %s938_s6 }
 0x2cd   :  { %p795_p9 = pnand %p793_p8, %p790_p7 }
 0x2cf   :  { %798 = shalt.err (!%p795_p9)
}
 0x2d0   :  { %587 = dma.vmem_to_hbm [thread:$0]  %s585_s28, 128, %s938_s6, [#allocation5]  }
 0x2d1   :  { %803 = dma.done.wait [#allocation5], 128  }
 0x2d2   :  { %804 = vsyncadd [#allocation5], 4294967168 }
 0x2d3   :  { %591 = vsyncpa [#allocation4], 1 }
 0x2d4   :  { %592 = vsyncpa [#allocation7], 1 }
 0x2d5   :  { %593 = vsyncpa [#allocation5], 1 }

// kernel: tpu_custom_call.1
= control target key start
LH: loop header
LB: loop body
LE: loop exit
PB: predicated region body
PF: predicated region fallthrough
CT: control target
= control target key end

     0   :  { %11 = vsyncpa [#allocation4], 0  ;;  %s932_s0 = inlined_call_operand.vmem [shape: f32[8,1], index: 0, kind: input, shape index: {}]   ;;  %s933_s1 = inlined_call_operand.vmem [shape: f32[1,128], index: 1, kind: input, shape index: {}]   ;;  %s934_s2 = inlined_call_operand.hbm [shape: bf16[256,128], index: 2, kind: input, shape index: {}]   ;;  %s935_s3 = inlined_call_operand.vmem [shape: f32[1,128], index: 3, kind: input, shape index: {}]   ;;  %s936_s4 = inlined_call_operand.hbm [shape: bf16[128,128], index: 4, kind: input, shape index: {}]   ;;  %s937_s5 = inlined_call_operand.vmem [shape: f32[1,128], index: 5, kind: input, shape index: {}]   ;;  %s938_s6 = inlined_call_operand.hbm [shape: f32[8,128], index: 6, kind: output, shape index: {}]  }
   0x1   :  { %12 = vsyncpa [#allocation7], 0 }
   0x2   :  { %13 = vsyncpa [#allocation5], 0  ;;  %s805_s21 = smov [#allocation3]   ;;  %s733_s25 = scalar_lea.hbm %s934_s2, 2048 }
   0x3   :  { %s23_s22 = sshll.u32 %s805_s21, 4  ;;  %p734_p0 = scmp.ne.s32.totalorder %s934_s2, %s733_s25  ;;  %s24_s22 = int_to_ptr.vmem [resolvable:$true] %s23_s22 }
   0x4   :  { %p737_p1 = scmp.lt.u32.totalorder %s733_s25, %s934_s2 }
   0x6   :  { %p739_p2 = pnand %p737_p1, %p734_p0 }
   0x8   :  { %742 = shalt.err (!%p739_p2)
}
   0x9   :  { %s743_s30 = scalar_lea.vmem %s24_s22, 2048  ;;  %p748_p4 = scmp.lt.s32.totalorder %s24_s22, %s24_s22 }
   0xa   :  { %p744_p3 = scmp.ne.s32.totalorder %s24_s22, %s743_s30  ;;  %p749_p5 = scmp.lt.s32.totalorder %s743_s30, %s743_s30 }
   0xc   :  { %p750_p6 = por %p749_p5, %p748_p4 }
   0xe   :  { %p751_p7 = pnand %p750_p6, %p744_p3 }
  0x10   :  { %754 = shalt.err (!%p751_p7)
}
  0x11   :  { %s806_s7 = smov 64   ;;  %s807_s8 = smov 4  }
  0x12   :  { %29 = dma.hbm_to_vmem [thread:$0]  %s934_s2, 2048, %s24_s22, [#allocation4], %s806_s7, %s806_s7, %s807_s8  }
  0x13   :  { %s808_s11 = smov [#allocation6]   ;;  %s755_s15 = scalar_lea.hbm %s936_s4, 1024 }
  0x14   :  { %s37_s12 = sshll.u32 %s808_s11, 4  ;;  %p756_p8 = scmp.ne.s32.totalorder %s936_s4, %s755_s15  ;;  %s38_s12 = int_to_ptr.vmem [resolvable:$true] %s37_s12 }
  0x15   :  { %p759_p9 = scmp.lt.u32.totalorder %s755_s15, %s936_s4 }
  0x17   :  { %p761_p10 = pnand %p759_p9, %p756_p8 }
  0x19   :  { %764 = shalt.err (!%p761_p10)
}
  0x1a   :  { %s765_s20 = scalar_lea.vmem %s38_s12, 1024  ;;  %p770_p12 = scmp.lt.s32.totalorder %s38_s12, %s38_s12 }
  0x1b   :  { %p766_p11 = scmp.ne.s32.totalorder %s38_s12, %s765_s20  ;;  %p771_p13 = scmp.lt.s32.totalorder %s765_s20, %s765_s20 }
  0x1d   :  { %p772_p0 = por %p771_p13, %p770_p12 }
  0x1f   :  { %p773_p1 = pnand %p772_p0, %p766_p11 }
  0x21   :  { %776 = shalt.err (!%p773_p1)
}
  0x22   :  { %43 = dma.hbm_to_vmem [thread:$0]  %s936_s4, 1024, %s38_s12, [#allocation7], %s806_s7, %s806_s7, %s807_s8  }
  0x23   :  { %799 = dma.done.wait [#allocation4], 2048  }
  0x24   :  { %800 = vsyncadd [#allocation4], 4294965248 }
  0x25   :  { %801 = dma.done.wait [#allocation7], 1024  }
  0x26   :  { %802 = vsyncadd [#allocation7], 4294966272  ;;  %v809_v0 = vmov 0   ;;  %v53_v1 = vld [vmem:[%s932_s0] sm:$0xff]  ;;  %v701_v2 = vld [vmem:[#allocation3 + $0x40] sm:$0xff]   ;;  %v810_v19 = vmov 0.0  }
  0x27   :  { %700 = vset.pattern.permute.xlu0 %v809_v0  ;;  %v702_v3 = vld [vmem:[#allocation3] sm:$0xff]   ;;  %631 = vmatprep.subr.bf16.mxu0 %v701_v2  ;;  %v703_v4 = vld [vmem:[#allocation3 + $0x48] sm:$0xff]   ;;  %v705_v6 = vld [vmem:[#allocation3 + $0x50] sm:$0xff]   ;;  %v811_v34 = vmov 683565275   ;;  %s818_s27 = smov [#allocation8]  }
  0x28   :  { %57 = vperm.xlu0 %700, %v53_v1   ;;  %632 = vmatpush3.bf16.msra.mxu0 %v702_v3  ;;  %v704_v5 = vld [vmem:[#allocation3 + $0x8] sm:$0xff]   ;;  %v706_v7 = vld [vmem:[#allocation3 + $0x10] sm:$0xff]   ;;  %v707_v8 = vld [vmem:[#allocation3 + $0x58] sm:$0xff]   ;;  %v812_v36 = vmov 2475754826   ;;  %s584_s28 = sshll.u32 %s818_s27, 4  ;;  %s585_s28 = int_to_ptr.vmem [resolvable:$true] %s584_s28 }
  0x29   :  { %633 = vmatprep.subr.bf16.mxu0 %v703_v4  ;;  %v708_v9 = vld [vmem:[#allocation3 + $0x18] sm:$0xff]   ;;  %v709_v10 = vld [vmem:[#allocation3 + $0x60] sm:$0xff]   ;;  %v711_v12 = vld [vmem:[#allocation3 + $0x68] sm:$0xff]   ;;  %662 = vmatprep.subr.bf16.mxu1 %v810_v19  ;;  %v813_v39 = vmov 2131351028   ;;  %p782_p3 = scmp.lt.s32.totalorder %s585_s28, %s585_s28 }
  0x2a   :  { %v710_v11 = vld [vmem:[#allocation3 + $0x20] sm:$0xff]   ;;  %v712_v13 = vld [vmem:[#allocation3 + $0x28] sm:$0xff]   ;;  %v713_v14 = vld [vmem:[#allocation3 + $0x70] sm:$0xff]   ;;  %v814_v42 = vmov 2102212464  }
  0x2b   :  { %v714_v15 = vld [vmem:[#allocation3 + $0x30] sm:$0xff]   ;;  %v715_v16 = vld [vmem:[#allocation3 + $0x78] sm:$0xff]   ;;  %v719_v18 = vld [vmem:[#allocation6] sm:$0xff]   ;;  %v815_v45 = vmov 920167782  }
  0x2c   :  { %634 = vmatpush3.bf16.msra.mxu0 %v704_v5  ;;  %v716_v17 = vld [vmem:[#allocation3 + $0x38] sm:$0xff]   ;;  %663 = vmatpush3.bf16.msra.mxu1 %v719_v18  ;;  %v720_v20 = vld [vmem:[#allocation6 + $0x8] sm:$0xff]   ;;  %v816_v48 = vmov 1326507024  }
  0x2d   :  { %635 = vmatprep.subr.bf16.mxu0 %v705_v6  ;;  %664 = vmatprep.subr.bf16.mxu1 %v810_v19  ;;  %v594_v21 = vld [vmem:[%s933_s1] ss:$0 sm:$0xff] }
  0x30   :  { %636 = vmatpush3.bf16.msra.mxu0 %v706_v7  ;;  %665 = vmatpush3.bf16.msra.mxu1 %v720_v20 }
  0x31   :  { %637 = vmatprep.subr.bf16.mxu0 %v707_v8  ;;  %666 = vmatprep.subr.bf16.mxu1 %v810_v19 }
  0x34   :  { %638 = vmatpush3.bf16.msra.mxu0 %v708_v9 }
  0x35   :  { %639 = vmatprep.subr.bf16.mxu0 %v709_v10 }
  0x38   :  { %640 = vmatpush3.bf16.msra.mxu0 %v710_v11 }
  0x39   :  { %641 = vmatprep.subr.bf16.mxu0 %v711_v12 }
  0x3c   :  { %642 = vmatpush3.bf16.msra.mxu0 %v712_v13 }
  0x3d   :  { %643 = vmatprep.subr.bf16.mxu0 %v713_v14 }
  0x40   :  { %644 = vmatpush3.bf16.msra.mxu0 %v714_v15 }
  0x41   :  { %645 = vmatprep.subr.bf16.mxu0 %v715_v16 }
  0x44   :  { %646 = vmatpush3.bf16.msra.mxu0 %v716_v17 }
  0xa7   :  { %v58_v22 = vpop.permute.xlu0 %57 }
  0xa8   :  { %v887_v23 = vmul.f32 %v594_v21, %v58_v22 }
  0xaa   :  { %v70_v24 = vand.u32 2139095040, %v887_v23  ;;  %v67_v28 = vand.u32 2147483647, %v887_v23  ;;  %vm69_vm7 = vcmp.lt.s32.totalorder %v887_v23, 0  ;;  %vm159_vm15 = vweird.f32 %v887_v23 }
  0xac   :  { %v71_v25 = vshrl.u32 %v70_v24, 23  ;;  %v74_v31 = vand.u32 8388607, %v67_v28  ;;  %vm68_vm8 = vcmp.le.f32.partialorder %v67_v28, 0.7853982 }
  0xae   :  { %v595_v26 = vadd.s32 4294967169, %v71_v25  ;;  %v75_v50 = vor.u32 8388608, %v74_v31 }
  0xb0   :  { %v77_v27 = vadd.s32 1, %v595_v26  ;;  %v115_v0 = vshll.u32 %v75_v50, 8 }
  0xb2   :  { %vm78_vm0 = vcmp.gt.s32.totalorder %v77_v27, 0 }
  0xb3   :  { %v79_v29 = vsel %vm78_vm0, %v77_v27, 0  ;;  %vm817_vm0 = vmmov 0  }
  0xb4   :  { %v81_v30 = vand.u32 31, %v79_v29  ;;  %v80_v33 = vshrl.u32 %v79_v29, 5  ;;  %678 = vmatprep.mubr.msk.bf16.mxu1 %vm817_vm0, %v810_v19 }
  0xb6   :  { %v82_v32 = vsub.s32 32, %v81_v30  ;;  %v84_v35 = vshll.u32 %v811_v34, %v81_v30  ;;  %v87_v37 = vshll.u32 %v812_v36, %v81_v30  ;;  %v90_v41 = vshll.u32 %v813_v39, %v81_v30 }
  0xb7   :  { %v93_v44 = vshll.u32 %v814_v42, %v81_v30  ;;  %v96_v47 = vshll.u32 %v815_v45, %v81_v30  ;;  %vm99_vm1 = vcmp.lt.s32.totalorder %v80_v33, 1  ;;  %vm102_vm2 = vcmp.lt.s32.totalorder %v80_v33, 4 }
  0xb8   :  { %v85_v38 = vshrl.u32 %v812_v36, %v82_v32  ;;  %v88_v40 = vshrl.u32 %v813_v39, %v82_v32  ;;  %v91_v43 = vshrl.u32 %v814_v42, %v82_v32  ;;  %v94_v46 = vshrl.u32 %v815_v45, %v82_v32 }
  0xb9   :  { %v97_v49 = vshrl.u32 %v816_v48, %v82_v32  ;;  %v83_v59 = vshrl.u32 %v811_v34, %v82_v32  ;;  %vm101_vm3 = vcmp.lt.s32.totalorder %v80_v33, 3  ;;  %vm100_vm4 = vcmp.lt.s32.totalorder %v80_v33, 2 }
  0xba   :  { %v86_v51 = vor.u32 %v85_v38, %v84_v35  ;;  %v89_v52 = vor.u32 %v88_v40, %v87_v37  ;;  %v92_v53 = vor.u32 %v91_v43, %v90_v41  ;;  %v95_v54 = vor.u32 %v94_v46, %v93_v44 }
  0xbb   :  { %v98_v55 = vor.u32 %v97_v49, %v96_v47 }
  0xbc   :  { %v104_v56 = vsel %vm102_vm2, %v92_v53, 2102212464  ;;  %v107_v57 = vsel %vm99_vm1, %v86_v51, %v89_v52  ;;  %v111_v58 = vsel %vm99_vm1, %v89_v52, %v92_v53  ;;  %v108_v60 = vsel %vm102_vm2, %v95_v54, 920167782 }
  0xbd   :  { %v112_v61 = vsel %vm102_vm2, %v98_v55, 1326507024  ;;  %v109_v62 = vsel %vm101_vm3, %v92_v53, %v108_v60  ;;  %v103_v1 = vsel %vm99_vm1, %v83_v59, %v86_v51  ;;  %v105_v2 = vsel %vm101_vm3, %v89_v52, %v104_v56 }
  0xbe   :  { %v113_v63 = vsel %vm101_vm3, %v95_v54, %v112_v61  ;;  %v110_v3 = vsel %vm100_vm4, %v107_v57, %v109_v62  ;;  %v106_v9 = vsel %vm100_vm4, %v103_v1, %v105_v2  ;;  %v724_v1 = vld [vmem:[#allocation6 + $0x28] sm:$0xff]   ;;  %v725_v2 = vld [vmem:[#allocation6 + $0x30] sm:$0xff]  }
  0xbf   :  { %v114_v4 = vsel %vm100_vm4, %v111_v58, %v113_v63  ;;  %v896_v7 = vmul.u32.u64.low %v115_v0, %v110_v3  ;;  %v897_v8 = vmul.u32.u64.high %v115_v0, %v110_v3, %v896_v7  ;;  %v122_v11 = vmul.u32 %v115_v0, %v106_v9  ;;  %v721_v63 = vld [vmem:[#allocation6 + $0x10] sm:$0xff]   ;;  %v726_v3 = vld [vmem:[#allocation6 + $0x38] sm:$0xff]  }
  0xc0   :  { %v893_v5 = vmul.u32.u64.low %v115_v0, %v114_v4  ;;  %v894_v6 = vmul.u32.u64.high %v115_v0, %v114_v4, %v893_v5  ;;  %667 = vmatpush3.bf16.msra.mxu1 %v721_v63  ;;  %v722_v0 = vld [vmem:[#allocation6 + $0x18] sm:$0xff]  }
  0xc1   :  { %v125_v10 = vadd.s32 1, %v897_v8  ;;  %668 = vmatprep.subr.bf16.mxu1 %v810_v19  ;;  %v603_v5 = vld [vmem:[%s935_s3] ss:$0 sm:$0xff]  ;;  %s777_s3 = scalar_lea.vmem %s585_s28, 128 }
  0xc2   :  { %vm124_vm5 = vc.u32 %v894_v6, %v896_v7  ;;  %v123_v25 = vadd.s32 %v896_v7, %v894_v6  ;;  %p778_p2 = scmp.ne.s32.totalorder %s585_s28, %s777_s3  ;;  %p783_p4 = scmp.lt.s32.totalorder %s777_s3, %s777_s3 }
  0xc3   :  { %v126_v12 = vsel %vm124_vm5, %v125_v10, %v897_v8 }
  0xc4   :  { %v127_v13 = vadd.s32 %v126_v12, %v122_v11  ;;  %669 = vmatpush3.bf16.msra.mxu1 %v722_v0  ;;  %p784_p5 = por %p783_p4, %p782_p3 }
  0xc5   :  { %670 = vmatprep.subr.bf16.mxu1 %v810_v19 }
  0xc6   :  { %v128_v14 = vadd.s32 536870912, %v127_v13  ;;  %p785_p6 = pnand %p784_p5, %p778_p2 }
  0xc8   :  { %v129_v15 = vshrl.u32 %v128_v14, 30 }
  0xca   :  { %v130_v16 = vshll.u32 %v129_v15, 30  ;;  %v153_v38 = vsub.s32 4, %v129_v15 }
  0xcc   :  { %v131_v17 = vsub.s32 %v127_v13, %v130_v16  ;;  %v154_v41 = vsel %vm69_vm7, %v153_v38, %v129_v15 }
  0xcd   :  { %v156_v43 = vsel %vm68_vm8, 0, %v154_v41 }
  0xce   :  { %v133_v18 = vsub.s32 0, %v131_v17  ;;  %v265_v44 = vadd.s32 3, %v156_v43  ;;  %v160_v45 = vand.u32 3, %v156_v43 }
  0xd0   :  { %v596_v20 = vmin.u32 %v133_v18, %v131_v17  ;;  %v266_v46 = vand.u32 3, %v265_v44  ;;  %vm165_vm9 = vcmp.eq.s32.totalorder %v160_v45, 2  ;;  %vm162_vm11 = vcmp.eq.s32.totalorder %v160_v45, 0 }
  0xd1   :  { %vm161_vm13 = vcmp.lt.s32.totalorder %v160_v45, 2 }
  0xd2   :  { %v135_v21 = vclz %v596_v20  ;;  %vm271_vm10 = vcmp.eq.s32.totalorder %v266_v46, 2  ;;  %vm268_vm12 = vcmp.eq.s32.totalorder %v266_v46, 0  ;;  %vm267_vm14 = vcmp.lt.s32.totalorder %v266_v46, 2 }
  0xd4   :  { %v597_v22 = vadd.s32 4294967294, %v135_v21 }
  0xd6   :  { %vm598_vm6 = vcmp.lt.s32.totalorder %v597_v22, 0 }
  0xd7   :  { %v138_v24 = vsel %vm598_vm6, 0, %v597_v22 }
  0xd8   :  { %v139_v26 = vsub.s32 32, %v138_v24  ;;  %v143_v27 = vsub.s32 4294967266, %v138_v24  ;;  %v140_v29 = vshll.u32 %v131_v17, %v138_v24 }
  0xda   :  { %v141_v30 = vshrl.u32 %v123_v25, %v139_v26  ;;  %v144_v31 = vadd.s32 127, %v143_v27 }
  0xdc   :  { %v142_v32 = vor.u32 %v141_v30, %v140_v29  ;;  %v145_v33 = vshll.u32 %v144_v31, 23 }
  0xde   :  { %v146_v34 = vor.u32 4788187, %v145_v33  ;;  %v149_v36 = vcvt.s32.f32 %v142_v32 }
  0xe0   :  { %v147_v35 = vand.u32 2147483647, %v146_v34 }
  0xe2   :  { %v150_v37 = vmul.f32 %v149_v36, %v147_v35 }
  0xe4   :  { %v151_v39 = vxor.u32 2147483648, %v150_v37 }
  0xe6   :  { %v152_v40 = vsel %vm69_vm7, %v151_v39, %v150_v37 }
  0xe7   :  { %v155_v42 = vsel %vm68_vm8, %v887_v23, %v152_v40  ;;  %v723_v23 = vld [vmem:[#allocation6 + $0x20] sm:$0xff]  }
  0xe8   :  { %727 = vcosq.f32 %v155_v42  ;;  %671 = vmatpush3.bf16.msra.mxu1 %v723_v23 }
  0xe9   :  { %729 = vsinq.f32 %v155_v42  ;;  %672 = vmatprep.subr.bf16.mxu1 %v810_v19 }
  0xec   :  { %673 = vmatpush3.bf16.msra.mxu1 %v724_v1 }
  0xed   :  { %674 = vmatprep.subr.bf16.mxu1 %v810_v19 }
  0xf0   :  { %675 = vmatpush3.bf16.msra.mxu1 %v725_v2 }
  0xf1   :  { %676 = vmatprep.subr.bf16.mxu1 %v810_v19  ;;  %v622_v19 = vld [vmem:[%s937_s5] ss:$0 sm:$0xff] }
  0xf2   :  { %v728_v47 = vpop.eup %727 }
  0xf3   :  { %v730_v48 = vpop.eup %729  ;;  %v166_v49 = vxor.u32 2147483648, %v728_v47 }
  0xf4   :  { %v163_v50 = vxor.u32 2147483648, %v730_v48  ;;  %677 = vmatpush3.bf16.msra.mxu1 %v726_v3 }
  0xf5   :  { %v167_v51 = vsel %vm165_vm9, %v166_v49, %v730_v48  ;;  %v273_v28 = vsel %vm271_vm10, %v166_v49, %v730_v48 }
  0xf6   :  { %v164_v52 = vsel %vm162_vm11, %v728_v47, %v163_v50  ;;  %v270_v53 = vsel %vm268_vm12, %v728_v47, %v163_v50 }
  0xf7   :  { %v168_v54 = vsel %vm161_vm13, %v164_v52, %v167_v51  ;;  %v274_v55 = vsel %vm267_vm14, %v270_v53, %v273_v28 }
  0xf8   :  { %v169_v56 = vsel %vm159_vm15, nan, %v168_v54  ;;  %v275_v57 = vsel %vm159_vm15, nan, %v274_v55 }
  0xf9   :  { %v170_v58 = vpack.c.bf16 %v169_v56, %v169_v56  ;;  %v276_v59 = vpack.c.bf16 %v275_v57, %v275_v57 }
  0xfb   :  { %171 = vst [vmem:[#allocation2] sm:$0xf] %v170_v58  ;;  %277 = vst [vmem:[#allocation2 + $0x4] sm:$0xf] %v276_v59 }
 0x102   :  { %v278_v60 = vld [vmem:[#allocation2] sm:$0xff] }
 0x103   :  { %v604_v61 = vcombine.low %v278_v60, %v278_v60  ;;  %v605_v62 = vcombine.high %v278_v60, %v278_v60 }
 0x105   :  { %453 = vmatprep.mubr.bf16.mxu0 %v605_v62 }
 0x106   :  { %454 = vmatmul.mubr.bf16.vlgmr.msra.gmra.mrb[0].mxu0 %v604_v61 }
 0x1d9   :  { %v647_v4 = vpop.f32.mrb[0].mxu0 }
 0x1da   :  { %v648_v6 = vpop.f32.mrb[1].mxu0 }
 0x1db   :  { %v649_v7 = vadd.f32 %v648_v6, %v647_v4  ;;  %v650_v8 = vpop.f32.mrb[2].mxu0 }
 0x1dc   :  { %v651_v9 = vpop.f32.mrb[3].mxu0 }
 0x1dd   :  { %v456_v10 = vadd.f32 %v649_v7, %v603_v5 }
 0x1df   :  { %v461_v11 = vmul.f32 0.5, %v456_v10 }
 0x1e1   :  { %731 = vtanh.f32 %v461_v11 }
 0x1eb   :  { %v732_v12 = vpop.eup %731 }
 0x1ec   :  { %v463_v13 = vadd.f32 1.0, %v732_v12 }
 0x1ee   :  { %v464_v14 = vmul.f32 %v463_v13, %v461_v11 }
 0x1f0   :  { %v465_v15 = vpack.c.bf16 %v464_v14, %v464_v14 }
 0x1f2   :  { %679 = vmatmul.mubr.bf16.vlgmr.msra.gmra.mrb[0].mxu1 %v465_v15 }
 0x2c5   :  { %v571_v16 = vpop.f32.mrb[0].mxu1 }
 0x2c6   :  { %v572_v17 = vadd.f32 %v622_v19, %v571_v16  ;;  %v680_v18 = vpop.f32.mrb[1].mxu1 }
 0x2c7   :  { %v574_v20 = vpop.f32.mrb[2].mxu1 }
 0x2c8   :  { %577 = vst [vmem:[#allocation8] sm:$0xff] %v572_v17  ;;  %v681_v21 = vpop.f32.mrb[3].mxu1 }
 0x2c9   :  { %788 = shalt.err (!%p785_p6)
}
 0x2ca   :  { %s789_s5 = scalar_lea.hbm %s938_s6, 128 }
 0x2cb   :  { %p790_p7 = scmp.ne.s32.totalorder %s938_s6, %s789_s5  ;;  %p793_p8 = scmp.lt.u32.totalorder %s789_s5, %s938_s6 }
 0x2cd   :  { %p795_p9 = pnand %p793_p8, %p790_p7 }
 0x2cf   :  { %798 = shalt.err (!%p795_p9)
}
 0x2d0   :  { %587 = dma.vmem_to_hbm [thread:$0]  %s585_s28, 128, %s938_s6, [#allocation5]  }
 0x2d1   :  { %803 = dma.done.wait [#allocation5], 128  }
 0x2d2   :  { %804 = vsyncadd [#allocation5], 4294967168 }
 0x2d3   :  { %591 = vsyncpa [#allocation4], 1 }
 0x2d4   :  { %592 = vsyncpa [#allocation7], 1 }
 0x2d5   :  { %593 = vsyncpa [#allocation5], 1 }

</bundles_post_ra>
